<compile_context>
chip_gen: v7x
topology: tpu7x:2x2x1
jax: 0.10.0
libtpu: 0.0.40
codegen_flags: <defaults>
</compile_context>

<pallas_src>
import functools

import jax
import jax.numpy as jnp
from jax.experimental import pallas as pl
from jax.experimental.pallas import tpu as pltpu

LANE = 128


def _round_up(n, m):
    return ((n + m - 1) // m) * m


def _cdiv(a, b):
    return (a + b - 1) // b


def _pad_to(a, shape):
    pads = [(0, t - s) for s, t in zip(a.shape, shape)]
    if all(p == (0, 0) for p in pads):
        return a
    return jnp.pad(a, pads)


def mlp_kernel(x_ref, w1_ref, b1_ref, w2_ref, b2_ref, o_ref, *, d_out):
    # One batch tile per grid step: Linear -> ReLU -> Linear fused in VMEM.
    x = x_ref[...]                                                    # [TB, D_in]
    h = jnp.dot(x, w1_ref[...], preferred_element_type=jnp.float32)  # [TB, 128]
    h = jnp.maximum(h + b1_ref[...], 0.0)                            # f32 VPU epilogue
    y = jnp.dot(h.astype(w2_ref.dtype), w2_ref[...],
                preferred_element_type=jnp.float32)                  # [TB, 128]
    y = y + b2_ref[...]
    # Slice padded lanes off BEFORE the store: only the real d_out columns are
    # written back to HBM (narrow masked store is cheap on a mem-bound kernel).
    o_ref[...] = y[:, :d_out].astype(o_ref.dtype)


def prepare_params(w1, b1, w2, b2, *, compute_dtype=jnp.bfloat16):
    """One-time parameter prep (cache the result across forward calls).

    PyTorch layout in:  w1 [H, D_in], b1 [H], w2 [D_out, H], b2 [D_out].
    Pre-transposed to [in, out] and zero-padded to 128 lanes; zero padding is
    algebraically inert through ReLU and the second matmul.
    """
    h, d_in = w1.shape
    d_out = w2.shape[0]
    h_p = _round_up(h, LANE)          # 10 -> 128 (lane-dense hidden)
    d_out_p = _round_up(d_out, LANE)  # 4  -> 128 (compute-only padding)

    w1_t = _pad_to(w1.T, (d_in, h_p)).astype(compute_dtype)            # [D_in, 128]
    w2_t = _pad_to(w2.T, (h_p, d_out_p)).astype(compute_dtype)         # [128, 128]
    b1_p = _pad_to(b1.reshape(1, h), (1, h_p)).astype(jnp.float32)     # [1, 128]
    b2_p = _pad_to(b2.reshape(1, d_out), (1, d_out_p)).astype(jnp.float32)
    return dict(w1_t=w1_t, b1_p=b1_p, w2_t=w2_t, b2_p=b2_p,
                d_out=d_out, compute_dtype=compute_dtype)


def linear_regression_forward(x, params):
    """ReLU(x @ w1.T + b1) @ w2.T + b2 using pre-prepared (padded) params."""
    w1_t, b1_p = params["w1_t"], params["b1_p"]
    w2_t, b2_p = params["w2_t"], params["b2_p"]
    d_out = params["d_out"]
    compute_dtype = params["compute_dtype"]

    B, d_in = x.shape
    assert w1_t.shape[0] == d_in
    h_p = w1_t.shape[1]
    d_out_p = w2_t.shape[1]

    # --- batch tiling ----------------------------------------------------
    b8 = _round_up(B, 8)
    in_bytes = jnp.dtype(compute_dtype).itemsize
    # Double-buffered x + out tiles must stay well inside the scoped-VMEM
    # default on every generation (v7x: 32 MiB scoped / 64 MiB physical).
    bytes_per_row = 2 * d_in * in_bytes + 2 * d_out * 4
    cap = max(8, min(2048, ((16 << 20) // bytes_per_row) // 8 * 8))
    n_steps = max(1, _cdiv(b8, cap))
    if b8 >= 16:
        n_steps = max(n_steps, 2)   # >=2 grid steps: keep both v7x TCs busy
    tb = _round_up(_cdiv(b8, n_steps), 8)
    b_p = n_steps * tb              # pads at most ~8 rows per step (no TB cliff)

    x_p = _pad_to(x, (b_p, d_in)).astype(compute_dtype)

    vmem = pltpu.MemorySpace.VMEM
    kernel = functools.partial(mlp_kernel, d_out=d_out)
    out = pl.pallas_call(
        kernel,
        out_shape=jax.ShapeDtypeStruct((b_p, d_out), jnp.float32),
        grid=(n_steps,),
        in_specs=[
            # x / out tiled over batch (double-buffered by BlockSpec);
            # weights & biases use full-extent blocks -> resident in VMEM.
            pl.BlockSpec((tb, d_in), lambda i: (i, 0), memory_space=vmem),
            pl.BlockSpec((d_in, h_p), lambda i: (0, 0), memory_space=vmem),
            pl.BlockSpec((1, h_p), lambda i: (0, 0), memory_space=vmem),
            pl.BlockSpec((h_p, d_out_p), lambda i: (0, 0), memory_space=vmem),
            pl.BlockSpec((1, d_out_p), lambda i: (0, 0), memory_space=vmem),
        ],
        out_specs=pl.BlockSpec((tb, d_out), lambda i: (i, 0), memory_space=vmem),
        compiler_params=pltpu.CompilerParams(
            dimension_semantics=("parallel",)),
    )(x_p, w1_t, b1_p, w2_t, b2_p)

    return out if b_p == B else out[:B]


def init_params(key, input_dim, output_dim, hidden=10):
    # Deterministic init mimicking PyTorch's U(-1/sqrt(fan_in), 1/sqrt(fan_in)).
    k1, k2, k3, k4 = jax.random.split(key, 4)
    bound1 = 1.0 / (input_dim ** 0.5)
    bound2 = 1.0 / (hidden ** 0.5)
    w1 = jax.random.uniform(k1, (hidden, input_dim), jnp.float32, -bound1, bound1)
    b1 = jax.random.uniform(k2, (hidden,), jnp.float32, -bound1, bound1)
    w2 = jax.random.uniform(k3, (output_dim, hidden), jnp.float32, -bound2, bound2)
    b2 = jax.random.uniform(k4, (output_dim,), jnp.float32, -bound2, bound2)
    return w1, b1, w2, b2


if __name__ == "__main__":
    key = jax.random.PRNGKey(0)
    kx, kp = jax.random.split(key)

    batch, input_dim, output_dim, hidden = 8, 32, 4, 10
    x = jax.random.normal(kx, (batch, input_dim), jnp.float32)
    w1, b1, w2, b2 = init_params(kp, input_dim, output_dim, hidden)

    # Pure-JAX reference.
    def ref_fn(xx):
        return jnp.maximum(xx @ w1.T + b1, 0.0) @ w2.T + b2

    # f32 MXU-feed path: tight match to the reference.
    params_f32 = prepare_params(w1, b1, w2, b2, compute_dtype=jnp.float32)
    out_f32 = jax.block_until_ready(linear_regression_forward(x, params_f32))
    assert out_f32.shape == (batch, output_dim)
    assert jnp.allclose(out_f32, ref_fn(x), atol=1e-5, rtol=1e-5)

    # Default bf16 MXU-feed path (f32 accumulation): looser tolerance.
    params = prepare_params(w1, b1, w2, b2)
    out = jax.block_until_ready(linear_regression_forward(x, params))
    assert out.shape == (batch, output_dim)
    assert jnp.allclose(out, ref_fn(x), atol=1e-1, rtol=1e-1)

    # Larger, non-divisible batch: exercises the >=2-step grid (v7x megacore
    # path) and the small tail-row padding.
    x_big = jax.random.normal(kx, (100, input_dim), jnp.float32)
    out_big = jax.block_until_ready(linear_regression_forward(x_big, params))
    assert out_big.shape == (100, output_dim)
    assert jnp.allclose(out_big, ref_fn(x_big), atol=1e-1, rtol=1e-1)

    print("KERNEL_OK")
</pallas_src>

<mosaic_0001>
module attributes {stable_mosaic.version = 11 : i64} {
  func.func @mlp_kernel(%arg0: i32, %arg1: memref<8x32xf32, #tpu.memory_space<vmem>>, %arg2: memref<32x128xf32, #tpu.memory_space<vmem>>, %arg3: memref<1x128xf32, #tpu.memory_space<vmem>>, %arg4: memref<128x128xf32, #tpu.memory_space<vmem>>, %arg5: memref<1x128xf32, #tpu.memory_space<vmem>>, %arg6: memref<8x4xf32, #tpu.memory_space<vmem>>) attributes {dimension_semantics = [#tpu.dimension_semantics<parallel>], iteration_bounds = array<i64: 1>, scalar_prefetch = 0 : i64, scratch_operands = 0 : i64, tpu.core_type = #tpu.core_type<tc>, window_params = [{transform_indices = @transform_0, window_bounds = array<i64: 8, 32>}, {pipeline_mode = #tpu.pipeline_mode<synchronous>, transform_indices = @transform_1, window_bounds = array<i64: 32, 128>}, {pipeline_mode = #tpu.pipeline_mode<synchronous>, transform_indices = @transform_2, window_bounds = array<i64: 1, 128>}, {pipeline_mode = #tpu.pipeline_mode<synchronous>, transform_indices = @transform_3, window_bounds = array<i64: 128, 128>}, {pipeline_mode = #tpu.pipeline_mode<synchronous>, transform_indices = @transform_4, window_bounds = array<i64: 1, 128>}, {transform_indices = @transform_5, window_bounds = array<i64: 8, 4>}]} {
    %c0 = arith.constant 0 : index
    %c0_0 = arith.constant 0 : index
    %0 = vector.load %arg1[%c0, %c0_0] : memref<8x32xf32, #tpu.memory_space<vmem>>, vector<8x32xf32>
    %c0_1 = arith.constant 0 : index
    %c0_2 = arith.constant 0 : index
    %1 = vector.load %arg2[%c0_1, %c0_2] : memref<32x128xf32, #tpu.memory_space<vmem>>, vector<32x128xf32>
    %cst = arith.constant dense<0.000000e+00> : vector<8x128xf32>
    %2 = tpu.matmul %0, %1, %cst {dimension_numbers = #tpu.dot_dimension_numbers<[1], [0], [0], [1], [0, 0, 1, 1], [], []>} : vector<8x32xf32>, vector<32x128xf32>, vector<8x128xf32> -> vector<8x128xf32>
    %c0_3 = arith.constant 0 : index
    %c0_4 = arith.constant 0 : index
    %3 = vector.load %arg3[%c0_3, %c0_4] : memref<1x128xf32, #tpu.memory_space<vmem>>, vector<1x128xf32>
    %4 = vector.broadcast %3 : vector<1x128xf32> to vector<8x128xf32>
    %5 = arith.addf %2, %4 : vector<8x128xf32>
    %cst_5 = arith.constant 0.000000e+00 : f32
    %6 = vector.broadcast %cst_5 : f32 to vector<8x128xf32>
    %7 = arith.maximumf %5, %6 : vector<8x128xf32>
    %c0_6 = arith.constant 0 : index
    %c0_7 = arith.constant 0 : index
    %8 = vector.load %arg4[%c0_6, %c0_7] : memref<128x128xf32, #tpu.memory_space<vmem>>, vector<128x128xf32>
    %cst_8 = arith.constant dense<0.000000e+00> : vector<8x128xf32>
    %9 = tpu.matmul %7, %8, %cst_8 {dimension_numbers = #tpu.dot_dimension_numbers<[1], [0], [0], [1], [0, 0, 1, 1], [], []>} : vector<8x128xf32>, vector<128x128xf32>, vector<8x128xf32> -> vector<8x128xf32>
    %c0_9 = arith.constant 0 : index
    %c0_10 = arith.constant 0 : index
    %10 = vector.load %arg5[%c0_9, %c0_10] : memref<1x128xf32, #tpu.memory_space<vmem>>, vector<1x128xf32>
    %11 = vector.broadcast %10 : vector<1x128xf32> to vector<8x128xf32>
    %12 = arith.addf %9, %11 : vector<8x128xf32>
    %13 = vector.extract_strided_slice %12 {offsets = [0, 0], sizes = [8, 4], strides = [1, 1]} : vector<8x128xf32> to vector<8x4xf32>
    %c0_11 = arith.constant 0 : index
    %c0_12 = arith.constant 0 : index
    %14 = vector.load %arg6[%c0_11, %c0_12] : memref<8x4xf32, #tpu.memory_space<vmem>>, vector<8x4xf32>
    tpu.vector_store %arg6[%c0_11, %c0_12], %13 {strides = array<i32>} : memref<8x4xf32, #tpu.memory_space<vmem>>, vector<8x4xf32>,
    return
  }
  func.func @transform_0(%arg0: i32) -> (i32, i32) {
    %c0_i32 = arith.constant 0 : i32
    %c0_i32_0 = arith.constant 0 : i32
    return %arg0, %c0_i32 : i32, i32
  }
  func.func @transform_1(%arg0: i32) -> (i32, i32) {
    %c0_i32 = arith.constant 0 : i32
    %c0_i32_0 = arith.constant 0 : i32
    %c0_i32_1 = arith.constant 0 : i32
    return %c0_i32, %c0_i32_0 : i32, i32
  }
  func.func @transform_2(%arg0: i32) -> (i32, i32) {
    %c0_i32 = arith.constant 0 : i32
    %c0_i32_0 = arith.constant 0 : i32
    %c0_i32_1 = arith.constant 0 : i32
    return %c0_i32, %c0_i32_0 : i32, i32
  }
  func.func @transform_3(%arg0: i32) -> (i32, i32) {
    %c0_i32 = arith.constant 0 : i32
    %c0_i32_0 = arith.constant 0 : i32
    %c0_i32_1 = arith.constant 0 : i32
    return %c0_i32, %c0_i32_0 : i32, i32
  }
  func.func @transform_4(%arg0: i32) -> (i32, i32) {
    %c0_i32 = arith.constant 0 : i32
    %c0_i32_0 = arith.constant 0 : i32
    %c0_i32_1 = arith.constant 0 : i32
    return %c0_i32, %c0_i32_0 : i32, i32
  }
  func.func @transform_5(%arg0: i32) -> (i32, i32) {
    %c0_i32 = arith.constant 0 : i32
    %c0_i32_0 = arith.constant 0 : i32
    return %arg0, %c0_i32 : i32, i32
  }
}

</mosaic_0001>

<bundles_post_ra>
// kernel: tpu_custom_call.1
= control target key start
LH: loop header
LB: loop body
LE: loop exit
PB: predicated region body
PF: predicated region fallthrough
CT: control target
= control target key end

     0   :  { %10 = vsyncpa [#allocation3], 0  ;;  %s515_s0 = inlined_call_operand.hbm [shape: f32[8,32], index: 0, kind: input, shape index: {}]   ;;  %s516_s1 = inlined_call_operand.hbm [shape: f32[32,128], index: 1, kind: input, shape index: {}]   ;;  %s517_s2 = inlined_call_operand.vmem [shape: f32[1,128], index: 2, kind: input, shape index: {}]   ;;  %s518_s3 = inlined_call_operand.hbm [shape: f32[128,128], index: 3, kind: input, shape index: {}]   ;;  %s519_s4 = inlined_call_operand.vmem [shape: f32[1,128], index: 4, kind: input, shape index: {}]   ;;  %s520_s5 = inlined_call_operand.vmem [shape: f32[8,4], index: 5, kind: output, shape index: {}]  }
   0x1   :  { %11 = vsyncpa [#allocation5], 0  ;;  %s426_s18 = smov [#allocation4]   ;;  %s356_s22 = scalar_lea.hbm %s516_s1, 512 }
   0x2   :  { %s27_s19 = sshll.u32 %s426_s18, 4  ;;  %p357_p0 = scmp.ne.s32.totalorder %s516_s1, %s356_s22  ;;  %s28_s19 = int_to_ptr.vmem [resolvable:$true] %s27_s19 }
   0x3   :  { %p360_p1 = scmp.lt.u32.totalorder %s356_s22, %s516_s1 }
   0x5   :  { %p362_p2 = pnand %p360_p1, %p357_p0 }
   0x7   :  { %365 = shalt.err (!%p362_p2)
}
   0x8   :  { %s366_s27 = scalar_lea.vmem %s28_s19, 512  ;;  %p371_p4 = scmp.lt.s32.totalorder %s28_s19, %s28_s19 }
   0x9   :  { %p367_p3 = scmp.ne.s32.totalorder %s28_s19, %s366_s27  ;;  %p372_p5 = scmp.lt.s32.totalorder %s366_s27, %s366_s27 }
   0xb   :  { %p373_p6 = por %p372_p5, %p371_p4 }
   0xd   :  { %p374_p7 = pnand %p373_p6, %p367_p3 }
   0xf   :  { %377 = shalt.err (!%p374_p7)
}
  0x10   :  { %s427_s28 = smov 128   ;;  %s428_s29 = smov 8  }
  0x11   :  { %33 = dma.hbm_to_vmem [thread:$0]  %s516_s1, 512, %s28_s19, [#allocation5], %s427_s28, %s427_s28, %s428_s29  }
  0x12   :  { %s429_s7 = smov [#allocation2]   ;;  %s430_s9 = smov [#allocation6]  }
  0x13   :  { %s18_s8 = sshll.u32 %s429_s7, 4  ;;  %s41_s10 = sshll.u32 %s430_s9, 4  ;;  %s19_s8 = int_to_ptr.vmem [resolvable:$true] %s18_s8  ;;  %s42_s10 = int_to_ptr.vmem [resolvable:$true] %s41_s10 }
  0x14   :  { %s378_s13 = scalar_lea.hbm %s515_s0, 128 }
  0x15   :  { %p379_p8 = scmp.ne.s32.totalorder %s515_s0, %s378_s13  ;;  %p382_p9 = scmp.lt.u32.totalorder %s378_s13, %s515_s0 }
  0x17   :  { %p384_p10 = pnand %p382_p9, %p379_p8 }
  0x19   :  { %387 = shalt.err (!%p384_p10)
}
  0x1a   :  { %s388_s1 = scalar_lea.vmem %s19_s8, 128  ;;  %p393_p12 = scmp.lt.s32.totalorder %s19_s8, %s19_s8 }
  0x1b   :  { %p389_p11 = scmp.ne.s32.totalorder %s19_s8, %s388_s1  ;;  %p394_p13 = scmp.lt.s32.totalorder %s388_s1, %s388_s1 }
  0x1d   :  { %p395_p0 = por %p394_p13, %p393_p12 }
  0x1f   :  { %p396_p1 = pnand %p395_p0, %p389_p11 }
  0x21   :  { %399 = shalt.err (!%p396_p1)
}
  0x22   :  { %21 = dma.hbm_to_vmem [thread:$0]  %s515_s0, 128, %s19_s8, [#allocation3]  }
  0x23   :  { %s400_s22 = scalar_lea.hbm %s518_s3, 2048 }
  0x24   :  { %p401_p2 = scmp.ne.s32.totalorder %s518_s3, %s400_s22  ;;  %p404_p3 = scmp.lt.u32.totalorder %s400_s22, %s518_s3 }
  0x26   :  { %p406_p4 = pnand %p404_p3, %p401_p2 }
  0x28   :  { %409 = shalt.err (!%p406_p4)
}
  0x29   :  { %s410_s27 = scalar_lea.vmem %s42_s10, 2048  ;;  %p415_p6 = scmp.lt.s32.totalorder %s42_s10, %s42_s10 }
  0x2a   :  { %p411_p5 = scmp.ne.s32.totalorder %s42_s10, %s410_s27  ;;  %p416_p7 = scmp.lt.s32.totalorder %s410_s27, %s410_s27 }
  0x2c   :  { %p417_p8 = por %p416_p7, %p415_p6 }
  0x2e   :  { %p418_p9 = pnand %p417_p8, %p411_p5 }
  0x30   :  { %421 = shalt.err (!%p418_p9)
}
  0x31   :  { %47 = dma.hbm_to_vmem [thread:$0]  %s518_s3, 2048, %s42_s10, [#allocation5], %s427_s28, %s427_s28, %s428_s29  }
  0x32   :  { %422 = dma.done.wait [#allocation3], 128  }
  0x33   :  { %423 = vsyncadd [#allocation3], 4294967168 }
  0x34   :  { %424 = dma.done.wait [#allocation5], 2560  }
  0x35   :  { %425 = vsyncadd [#allocation5], 4294964736  ;;  %v431_v0 = vmov 0.0|0.0   ;;  %vm432_vm0 = vmmov 0   ;;  %v433_v1 = vmov 0.0   ;;  %v60_v2 = vld [vmem:[#allocation4] sm:$0xff] }
  0x36   :  { %318 = vmatprep.subr.bf16.mxu0 %v431_v0  ;;  %280 = vmatprep.mubr.msk.f32.mxu0 %vm432_vm0, %v433_v1  ;;  %v61_v3 = vld [vmem:[#allocation4 + $0x8] sm:$0xff]  ;;  %v62_v4 = vld [vmem:[#allocation4 + $0x10] sm:$0xff]  ;;  %v63_v6 = vld [vmem:[#allocation4 + $0x18] sm:$0xff]  ;;  %vm71_vm1 = vcmask 261120   ;;  %vm239_vm2 = vcmask 31744  }
  0x37   :  { %324 = vmatprep.subr.bf16.mxu1 %v431_v0  ;;  %315 = vmatprep.mubr.msk.f32.mxu1 %vm432_vm0, %v433_v1  ;;  %v319_v5 = vpack.c.bf16 %v61_v3, %v60_v2  ;;  %v146_v7 = vld [vmem:[#allocation6] sm:$0xff]  ;;  %v147_v8 = vld [vmem:[#allocation6 + $0x8] sm:$0xff]  ;;  %v148_v9 = vld [vmem:[#allocation6 + $0x10] sm:$0xff]  ;;  %v322_v11 = vpack.c.bf16 %v63_v6, %v62_v4 }
  0x38   :  { %v149_v10 = vld [vmem:[#allocation6 + $0x18] sm:$0xff]  ;;  %v325_v12 = vpack.c.bf16 %v147_v8, %v146_v7  ;;  %v150_v14 = vld [vmem:[#allocation6 + $0x20] sm:$0xff]  ;;  %v151_v15 = vld [vmem:[#allocation6 + $0x28] sm:$0xff] }
  0x39   :  { %320 = vmatpush3.bf16.msra.mxu0 %v319_v5  ;;  %v328_v13 = vpack.c.bf16 %v149_v10, %v148_v9  ;;  %v59_v16 = vld [vmem:[#allocation2] sm:$0xff]  ;;  %v331_v17 = vpack.c.bf16 %v151_v15, %v150_v14  ;;  %v152_v18 = vld [vmem:[#allocation6 + $0x30] sm:$0xff]  ;;  %v154_v21 = vld [vmem:[#allocation6 + $0x40] sm:$0xff] }
  0x3a   :  { %321 = vmatprep.subr.bf16.mxu0 %v431_v0  ;;  %326 = vmatpush3.bf16.msra.mxu1 %v325_v12  ;;  %v153_v19 = vld [vmem:[#allocation6 + $0x38] sm:$0xff]  ;;  %v155_v22 = vld [vmem:[#allocation6 + $0x48] sm:$0xff]  ;;  %v156_v24 = vld [vmem:[#allocation6 + $0x50] sm:$0xff] }
  0x3b   :  { %327 = vmatprep.subr.bf16.mxu1 %v431_v0  ;;  %v334_v20 = vpack.c.bf16 %v153_v19, %v152_v18  ;;  %v337_v23 = vpack.c.bf16 %v155_v22, %v154_v21  ;;  %v157_v25 = vld [vmem:[#allocation6 + $0x58] sm:$0xff]  ;;  %v158_v27 = vld [vmem:[#allocation6 + $0x60] sm:$0xff]  ;;  %v159_v28 = vld [vmem:[#allocation6 + $0x68] sm:$0xff] }
  0x3c   :  { %v340_v26 = vpack.c.bf16 %v157_v25, %v156_v24  ;;  %v343_v29 = vpack.c.bf16 %v159_v28, %v158_v27  ;;  %v160_v30 = vld [vmem:[#allocation6 + $0x70] sm:$0xff]  ;;  %v161_v31 = vld [vmem:[#allocation6 + $0x78] sm:$0xff] }
  0x3d   :  { %323 = vmatpush3.bf16.msra.mxu0 %v322_v11  ;;  %v346_v32 = vpack.c.bf16 %v161_v31, %v160_v30  ;;  %v247_v33 = vld [vmem:[%s517_s2] ss:$0 sm:$0xff] }
  0x3e   :  { %329 = vmatpush3.bf16.msra.mxu1 %v328_v13  ;;  %v249_v38 = vld [vmem:[%s519_s4] ss:$0 sm:$0xff] }
  0x3f   :  { %330 = vmatprep.subr.bf16.mxu1 %v431_v0 }
  0x40   :  { %281 = vmatmul.mubr.msk.f32.vlgmr.msra.gmra.mrb[0].mxu0 %vm71_vm1, %v59_v16 }
  0x42   :  { %332 = vmatpush3.bf16.msra.mxu1 %v331_v17 }
  0x43   :  { %333 = vmatprep.subr.bf16.mxu1 %v431_v0 }
  0x46   :  { %335 = vmatpush3.bf16.msra.mxu1 %v334_v20 }
  0x47   :  { %336 = vmatprep.subr.bf16.mxu1 %v431_v0 }
  0x4a   :  { %338 = vmatpush3.bf16.msra.mxu1 %v337_v23 }
  0x4b   :  { %339 = vmatprep.subr.bf16.mxu1 %v431_v0 }
  0x4e   :  { %341 = vmatpush3.bf16.msra.mxu1 %v340_v26 }
  0x4f   :  { %342 = vmatprep.subr.bf16.mxu1 %v431_v0 }
  0x52   :  { %344 = vmatpush3.bf16.msra.mxu1 %v343_v29 }
  0x53   :  { %345 = vmatprep.subr.bf16.mxu1 %v431_v0 }
  0x56   :  { %347 = vmatpush3.bf16.msra.mxu1 %v346_v32 }
 0x113   :  { %v141_v34 = vpop.f32.mrb[0].mxu0 }
 0x114   :  { %v142_v35 = vadd.f32 %v247_v33, %v141_v34  ;;  %v282_v36 = vpop.f32.mrb[1].mxu0 }
 0x116   :  { %v145_v37 = vmax.f32 %v142_v35, 0.0 }
 0x118   :  { %316 = vmatmul.mubr.f32.vlgmr.msra.gmra.mrb[0].mxu1 %v145_v37 }
 0x1eb   :  { %v235_v39 = vpop.f32.mrb[0].mxu1 }
 0x1ec   :  { %v236_v40 = vadd.f32 %v249_v38, %v235_v39  ;;  %v317_v41 = vpop.f32.mrb[1].mxu1 }
 0x1ee   :  { %240 = vst.msk [vmem:[%s520_s5] sm:$0xff] %vm239_vm2, %v236_v40 }
 0x1ef   :  { %245 = vsyncpa [#allocation3], 1 }
 0x1f0   :  { %246 = vsyncpa [#allocation5], 1 }

</bundles_post_ra>
